<compile_context>
chip_gen: v6e
topology: v6e:2x2x1
jax: 0.10.0
libtpu: 0.0.40
codegen_flags: <defaults>
</compile_context>

<pallas_src>
import functools

import jax
import jax.numpy as jnp
from jax.experimental import pallas as pl
from jax.experimental.pallas import tpu as pltpu


def _round_up(x, m):
    return (x + m - 1) // m * m


def pack_manual_rnn_params(w_i2h, b_i2h, w_i2o, b_i2o, input_size):
    """Pack PyTorch-layout Linear params into ONE fused, padded bf16 weight.

    Call once per parameter set (not per forward step).

    Packed weight layout, shape (Kp, Nc):
      rows    [0, I+H)       : transposed weights of both linears (fused K)
      row     I+H            : bias row (multiplied by the constant-1 lane)
      rows    [I+H+1, Kp)    : zero padding
      columns [0, H)         : i2h head (new hidden)
      columns [H, Hp)        : zero pad (padded hidden lanes -> 0)
      columns [Hp, Hp+O)     : i2o head (logits)
      columns [Hp+O, Nc)     : -1e30 sentinel bias (padded logits -> exp()=0)
    """
    f32 = jnp.float32
    H = w_i2h.shape[0]
    I = input_size
    O = w_i2o.shape[0]
    K = I + H
    assert w_i2h.shape == (H, K) and w_i2o.shape == (O, K)

    Kp = _round_up(K + 1, 128)   # fused reduction dim (+1 bias lane)
    Hp = _round_up(H, 128)       # lane-dense hidden head
    Op = _round_up(O, 128)       # lane-dense logits head
    Nc = Hp + Op                 # fused output width [hidden | logits]

    w = jnp.zeros((Kp, Nc), f32)
    w = w.at[:K, :H].set(w_i2h.T.astype(f32))
    w = w.at[:K, Hp:Hp + O].set(w_i2o.T.astype(f32))
    w = w.at[K, :H].set(b_i2h.astype(f32))
    w = w.at[K, Hp:Hp + O].set(b_i2o.astype(f32))
    w = w.at[K, Hp + O:].set(f32(-1e30))

    return {
        "w": w.astype(jnp.bfloat16),   # bf16 MXU feed; f32 accumulation in-kernel
        "I": I, "H": H, "O": O,
        "K": K, "Kp": Kp, "Hp": Hp, "Op": Op, "Nc": Nc,
    }


def _rnn_kernel(Hp, xh_ref, w_ref, out_ref, hid_ref):
    # Single fused MXU push: (BB, Kp) x (Kp, Nc) -> [hidden | logits],
    # bias already folded in via the constant-1 activation lane.
    comb = jnp.dot(xh_ref[...], w_ref[...], preferred_element_type=jnp.float32)

    hid = comb[:, :Hp]            # 128-aligned split, no relayout
    logits = comb[:, Hp:]

    # Numerically stable log_softmax along dim=1, all math in f32.
    # Padded logit lanes carry a -1e30 bias: never win the max, add exp()=0.
    m = jnp.max(logits, axis=1, keepdims=True)
    shifted = logits - m
    lse = jnp.log(jnp.sum(jnp.exp(shifted), axis=1, keepdims=True))

    out_ref[...] = (shifted - lse).astype(out_ref.dtype)
    hid_ref[...] = hid.astype(hid_ref.dtype)


def manual_rnn_forward(x, h, packed):
    """One RNN step. x: (B, I), h: (B, H), packed from pack_manual_rnn_params.
    Returns (log_softmax_output (B, O), new_hidden (B, H)), both f32."""
    f32 = jnp.float32
    I, H, O = packed["I"], packed["H"], packed["O"]
    K, Kp = packed["K"], packed["Kp"]
    Hp, Op, Nc = packed["Hp"], packed["Op"], packed["Nc"]
    w = packed["w"]

    B = x.shape[0]
    assert x.shape == (B, I) and h.shape == (B, H)

    # Batch tiling: sublane-dense, up to 256 rows per tile so large batches
    # get a parallel grid axis (uses both TensorCores on v7x).
    Bp = _round_up(B, 8)
    BB = Bp if Bp <= 256 else 256
    Bp = _round_up(Bp, BB)

    # Pack the per-step activation [x | h | 1] (the bias lane), pad to (Bp, Kp)
    # and cast to bf16 for the MXU.  The concat lives in the XLA wrapper, so
    # the kernel sees a single dense operand (no in-kernel concatenate).
    ones = jnp.ones((B, 1), f32)
    xh = jnp.concatenate([x.astype(f32), h.astype(f32), ones], axis=1)   # (B, K+1)
    xh = jnp.pad(xh, ((0, Bp - B), (0, Kp - (K + 1)))).astype(jnp.bfloat16)

    kernel = functools.partial(_rnn_kernel, Hp)

    out_p, hid_p = pl.pallas_call(
        kernel,
        out_shape=(
            jax.ShapeDtypeStruct((Bp, Op), f32),   # padded log-softmax output
            jax.ShapeDtypeStruct((Bp, Hp), f32),   # padded new hidden
        ),
        grid=(Bp // BB,),
        in_specs=[
            pl.BlockSpec((BB, Kp), lambda i: (i, 0)),
            pl.BlockSpec((Kp, Nc), lambda i: (0, 0)),  # weight VMEM-resident
        ],
        out_specs=(
            pl.BlockSpec((BB, Op), lambda i: (i, 0)),
            pl.BlockSpec((BB, Hp), lambda i: (i, 0)),
        ),
        compiler_params=pltpu.CompilerParams(dimension_semantics=("parallel",)),
    )(xh, w)

    # Strip padding back to the module's shapes.
    return out_p[:B, :O], hid_p[:B, :H]


def reference_forward(x, h, w_i2h, b_i2h, w_i2o, b_i2o):
    combined = jnp.concatenate([x, h], axis=1)
    hidden = combined @ w_i2h.T + b_i2h
    logits = combined @ w_i2o.T + b_i2o
    return jax.nn.log_softmax(logits, axis=1), hidden


if __name__ == "__main__":
    # Sizes implied by the module: batch, input_size, hidden_size, output_size.
    B, I, H, O = 2, 16, 32, 8

    key = jax.random.PRNGKey(0)
    kx, kh, k1, k2, k3, k4 = jax.random.split(key, 6)

    x = jax.random.normal(kx, (B, I), dtype=jnp.float32)
    h0 = jax.random.normal(kh, (B, H), dtype=jnp.float32)

    # Deterministic synthetic parameters (PyTorch nn.Linear layout).
    scale = 1.0 / jnp.sqrt(jnp.float32(I + H))
    w_i2h = jax.random.uniform(k1, (H, I + H), jnp.float32, -scale, scale)
    b_i2h = jax.random.uniform(k2, (H,), jnp.float32, -scale, scale)
    w_i2o = jax.random.uniform(k3, (O, I + H), jnp.float32, -scale, scale)
    b_i2o = jax.random.uniform(k4, (O,), jnp.float32, -scale, scale)

    # Pack (pad + fuse + bf16-cast) the parameters ONCE.
    packed = pack_manual_rnn_params(w_i2h, b_i2h, w_i2o, b_i2o, input_size=I)
    packed["w"] = jax.block_until_ready(packed["w"])

    out, hid = manual_rnn_forward(x, h0, packed)
    out, hid = jax.block_until_ready(out), jax.block_until_ready(hid)

    ref_out, ref_hid = reference_forward(x, h0, w_i2h, b_i2h, w_i2o, b_i2o)
    # bf16 MXU inputs (f32 accumulation) -> loosened tolerances per review.
    assert out.shape == (B, O) and hid.shape == (B, H)
    assert jnp.allclose(out, ref_out, atol=2e-2, rtol=2e-2), "output mismatch"
    assert jnp.allclose(hid, ref_hid, atol=2e-2, rtol=2e-2), "hidden mismatch"

    print("KERNEL_OK")
</pallas_src>

<mosaic_0001>
module attributes {stable_mosaic.version = 11 : i64} {
  func.func @_rnn_kernel(%arg0: i32, %arg1: memref<8x128xbf16, #tpu.memory_space<vmem>>, %arg2: memref<128x256xbf16, #tpu.memory_space<vmem>>, %arg3: memref<8x128xf32, #tpu.memory_space<vmem>>, %arg4: memref<8x128xf32, #tpu.memory_space<vmem>>) attributes {dimension_semantics = [#tpu.dimension_semantics<parallel>], iteration_bounds = array<i64: 1>, scalar_prefetch = 0 : i64, scratch_operands = 0 : i64, tpu.core_type = #tpu.core_type<tc>, window_params = [{transform_indices = @transform_0, window_bounds = array<i64: 8, 128>}, {pipeline_mode = #tpu.pipeline_mode<synchronous>, transform_indices = @transform_1, window_bounds = array<i64: 128, 256>}, {transform_indices = @transform_2, window_bounds = array<i64: 8, 128>}, {transform_indices = @transform_3, window_bounds = array<i64: 8, 128>}]} {
    %c0 = arith.constant 0 : index
    %c0_0 = arith.constant 0 : index
    %0 = vector.load %arg1[%c0, %c0_0] : memref<8x128xbf16, #tpu.memory_space<vmem>>, vector<8x128xbf16>
    %c0_1 = arith.constant 0 : index
    %c0_2 = arith.constant 0 : index
    %1 = vector.load %arg2[%c0_1, %c0_2] : memref<128x256xbf16, #tpu.memory_space<vmem>>, vector<128x256xbf16>
    %cst = arith.constant dense<0.000000e+00> : vector<8x256xf32>
    %2 = tpu.matmul %0, %1, %cst {dimension_numbers = #tpu.dot_dimension_numbers<[1], [0], [0], [1], [0, 0, 1, 1], [], []>} : vector<8x128xbf16>, vector<128x256xbf16>, vector<8x256xf32> -> vector<8x256xf32>
    %3 = vector.extract_strided_slice %2 {offsets = [0, 0], sizes = [8, 128], strides = [1, 1]} : vector<8x256xf32> to vector<8x128xf32>
    %4 = vector.extract_strided_slice %2 {offsets = [0, 128], sizes = [8, 128], strides = [1, 1]} : vector<8x256xf32> to vector<8x128xf32>
    %cst_3 = arith.constant dense<0xFF800000> : vector<8xf32>
    %5 = vector.multi_reduction <maximumf>, %4, %cst_3 [1] : vector<8x128xf32> to vector<8xf32>
    %6 = vector.shape_cast %5 : vector<8xf32> to vector<8x1xf32>
    %7 = vector.broadcast %6 : vector<8x1xf32> to vector<8x128xf32>
    %8 = arith.subf %4, %7 : vector<8x128xf32>
    %9 = math.exp %8 : vector<8x128xf32>
    %cst_4 = arith.constant dense<0.000000e+00> : vector<8xf32>
    %10 = vector.multi_reduction <add>, %9, %cst_4 [1] : vector<8x128xf32> to vector<8xf32>
    %11 = vector.shape_cast %10 : vector<8xf32> to vector<8x1xf32>
    %12 = math.log %11 : vector<8x1xf32>
    %13 = vector.broadcast %12 : vector<8x1xf32> to vector<8x128xf32>
    %14 = arith.subf %8, %13 : vector<8x128xf32>
    %c0_5 = arith.constant 0 : index
    %c0_6 = arith.constant 0 : index
    %15 = vector.load %arg3[%c0_5, %c0_6] : memref<8x128xf32, #tpu.memory_space<vmem>>, vector<8x128xf32>
    tpu.vector_store %arg3[%c0_5, %c0_6], %14 {strides = array<i32>} : memref<8x128xf32, #tpu.memory_space<vmem>>, vector<8x128xf32>,
    %c0_7 = arith.constant 0 : index
    %c0_8 = arith.constant 0 : index
    %16 = vector.load %arg4[%c0_7, %c0_8] : memref<8x128xf32, #tpu.memory_space<vmem>>, vector<8x128xf32>
    tpu.vector_store %arg4[%c0_7, %c0_8], %3 {strides = array<i32>} : memref<8x128xf32, #tpu.memory_space<vmem>>, vector<8x128xf32>,
    return
  }
  func.func @transform_0(%arg0: i32) -> (i32, i32) {
    %c0_i32 = arith.constant 0 : i32
    %c0_i32_0 = arith.constant 0 : i32
    return %arg0, %c0_i32 : i32, i32
  }
  func.func @transform_1(%arg0: i32) -> (i32, i32) {
    %c0_i32 = arith.constant 0 : i32
    %c0_i32_0 = arith.constant 0 : i32
    %c0_i32_1 = arith.constant 0 : i32
    return %c0_i32, %c0_i32_0 : i32, i32
  }
  func.func @transform_2(%arg0: i32) -> (i32, i32) {
    %c0_i32 = arith.constant 0 : i32
    %c0_i32_0 = arith.constant 0 : i32
    return %arg0, %c0_i32 : i32, i32
  }
  func.func @transform_3(%arg0: i32) -> (i32, i32) {
    %c0_i32 = arith.constant 0 : i32
    %c0_i32_0 = arith.constant 0 : i32
    return %arg0, %c0_i32 : i32, i32
  }
}

</mosaic_0001>

<bundles_post_ra>
// kernel: tpu_custom_call.1
= control target key start
LH: loop header
LB: loop body
LE: loop exit
PB: predicated region body
PF: predicated region fallthrough
CT: control target
= control target key end

     0   :  { %9 = vsyncpa [#allocation3], 0  ;;  %s400_s0 = inlined_call_operand.hbm [shape: bf16[8,128], index: 0, kind: input, shape index: {}]   ;;  %s401_s1 = inlined_call_operand.hbm [shape: bf16[128,256], index: 1, kind: input, shape index: {}]   ;;  %s402_s2 = inlined_call_operand.hbm [shape: f32[8,128], index: 2, kind: output, shape index: {0}]   ;;  %s403_s3 = inlined_call_operand.hbm [shape: f32[8,128], index: 3, kind: output, shape index: {1}]  }
   0x1   :  { %10 = vsyncpa [#allocation6], 0 }
   0x2   :  { %11 = vsyncpa [#allocation4], 0 }
   0x3   :  { %12 = vsyncpa [#allocation9], 0  ;;  %s361_s12 = smov [#allocation2]   ;;  %s362_s14 = smov [#allocation5]  }
   0x4   :  { %s19_s13 = sshll.u32 %s361_s12, 4  ;;  %s28_s15 = sshll.u32 %s362_s14, 4  ;;  %s20_s13 = int_to_ptr.vmem [resolvable:$true] %s19_s13  ;;  %s29_s15 = int_to_ptr.vmem [resolvable:$true] %s28_s15 }
   0x5   :  { %s281_s16 = scalar_lea.vmem %s20_s13, 64  ;;  %p286_p1 = scmp.lt.s32.totalorder %s20_s13, %s20_s13 }
   0x6   :  { %p282_p0 = scmp.ne.s32.totalorder %s20_s13, %s281_s16  ;;  %p287_p2 = scmp.lt.s32.totalorder %s281_s16, %s281_s16 }
   0x8   :  { %p288_p3 = por %p287_p2, %p286_p1 }
   0xa   :  { %p289_p4 = pnand %p288_p3, %p282_p0 }
   0xc   :  { %292 = shalt.err (!%p289_p4)
}
   0xd   :  { %22 = dma.hbm_to_vmem [thread:$0]  %s400_s0, 64, %s20_s13, [#allocation3]  }
   0xe   :  { %s301_s19 = scalar_lea.vmem %s29_s15, 2048  ;;  %p306_p6 = scmp.lt.s32.totalorder %s29_s15, %s29_s15 }
   0xf   :  { %p302_p5 = scmp.ne.s32.totalorder %s29_s15, %s301_s19  ;;  %p307_p7 = scmp.lt.s32.totalorder %s301_s19, %s301_s19 }
  0x11   :  { %p308_p8 = por %p307_p7, %p306_p6 }
  0x13   :  { %p309_p9 = pnand %p308_p8, %p302_p5 }
  0x15   :  { %312 = shalt.err (!%p309_p9)
}
  0x16   :  { %s363_s20 = smov 128   ;;  %s364_s21 = smov 8  }
  0x17   :  { %34 = dma.hbm_to_vmem [thread:$0]  %s401_s1, 2048, %s29_s15, [#allocation6], %s363_s20, %s363_s20, %s364_s21  }
  0x18   :  { %353 = dma.done.wait [#allocation3], 64  }
  0x19   :  { %354 = vsyncadd [#allocation3], 4294967232 }
  0x1a   :  { %355 = dma.done.wait [#allocation6], 2048  }
  0x1b   :  { %356 = vsyncadd [#allocation6], 4294965248  ;;  %v365_v0 = vmov 0   ;;  %v245_v1 = vld [vmem:[#allocation5 + $0x74] ss:$8 sps:$4 sm:$0xff]   ;;  %s366_s0 = smov [#allocation8]  }
  0x1c   :  { %171 = vmatprep.mubr.bf16.mxu0 %v365_v0  ;;  %v247_v2 = vld [vmem:[#allocation5 + $0x70] ss:$8 sps:$4 sm:$0xff]   ;;  %139 = vmatprep.subr.bf16.mxu0 %v245_v1  ;;  %v248_v3 = vld [vmem:[#allocation5 + $0x64] ss:$8 sps:$4 sm:$0xff]   ;;  %v250_v4 = vld [vmem:[#allocation5 + $0x60] ss:$8 sps:$4 sm:$0xff]  }
  0x1d   :  { %140 = vmatpush1.bf16.msra.mxu0 %v247_v2  ;;  %v251_v5 = vld [vmem:[#allocation5 + $0x54] ss:$8 sps:$4 sm:$0xff]   ;;  %v253_v6 = vld [vmem:[#allocation5 + $0x50] ss:$8 sps:$4 sm:$0xff]   ;;  %v254_v7 = vld [vmem:[#allocation5 + $0x44] ss:$8 sps:$4 sm:$0xff]  }
  0x1e   :  { %141 = vmatprep.subr.bf16.mxu0 %v248_v3  ;;  %v256_v8 = vld [vmem:[#allocation5 + $0x40] ss:$8 sps:$4 sm:$0xff]   ;;  %v257_v9 = vld [vmem:[#allocation5 + $0x34] ss:$8 sps:$4 sm:$0xff]   ;;  %v259_v10 = vld [vmem:[#allocation5 + $0x30] ss:$8 sps:$4 sm:$0xff]  }
  0x1f   :  { %v260_v11 = vld [vmem:[#allocation5 + $0x24] ss:$8 sps:$4 sm:$0xff]   ;;  %v262_v12 = vld [vmem:[#allocation5 + $0x20] ss:$8 sps:$4 sm:$0xff]   ;;  %v263_v13 = vld [vmem:[#allocation5 + $0x14] ss:$8 sps:$4 sm:$0xff]  }
  0x20   :  { %v265_v14 = vld [vmem:[#allocation5 + $0x10] ss:$8 sps:$4 sm:$0xff]   ;;  %v266_v15 = vld [vmem:[#allocation5 + $0x4] ss:$8 sps:$4 sm:$0xff]   ;;  %v268_v16 = vld [vmem:[#allocation5] ss:$8 sps:$4 sm:$0xff]  }
  0x21   :  { %142 = vmatpush1.bf16.msra.mxu0 %v250_v4  ;;  %v42_v17 = vld [vmem:[#allocation2] sm:$0xf]  ;;  %s208_s1 = sshll.u32 %s366_s0, 4  ;;  %s209_s1 = int_to_ptr.vmem [resolvable:$true] %s208_s1 }
  0x22   :  { %143 = vmatprep.subr.bf16.mxu0 %v251_v5  ;;  %s313_s24 = scalar_lea.vmem %s209_s1, 128  ;;  %p318_p11 = scmp.lt.s32.totalorder %s209_s1, %s209_s1 }
  0x23   :  { %p314_p10 = scmp.ne.s32.totalorder %s209_s1, %s313_s24  ;;  %p319_p12 = scmp.lt.s32.totalorder %s313_s24, %s313_s24 }
  0x25   :  { %144 = vmatpush1.bf16.msra.mxu0 %v253_v6  ;;  %p320_p13 = por %p319_p12, %p318_p11 }
  0x26   :  { %145 = vmatprep.subr.bf16.mxu0 %v254_v7 }
  0x27   :  { %p321_p0 = pnand %p320_p13, %p314_p10 }
  0x29   :  { %146 = vmatpush1.bf16.msra.mxu0 %v256_v8 }
  0x2a   :  { %147 = vmatprep.subr.bf16.mxu0 %v257_v9 }
  0x2d   :  { %148 = vmatpush1.bf16.msra.mxu0 %v259_v10 }
  0x2e   :  { %149 = vmatprep.subr.bf16.mxu0 %v260_v11 }
  0x31   :  { %150 = vmatpush1.bf16.msra.mxu0 %v262_v12 }
  0x32   :  { %151 = vmatprep.subr.bf16.mxu0 %v263_v13 }
  0x35   :  { %152 = vmatpush1.bf16.msra.mxu0 %v265_v14 }
  0x36   :  { %153 = vmatprep.subr.bf16.mxu0 %v266_v15 }
  0x39   :  { %154 = vmatpush1.bf16.msra.mxu0 %v268_v16 }
  0x3c   :  { %172 = vmatmul.mubr.bf16.vlgmr.msra.gmra.mxu0 %v42_v17 }
  0xfc   :  { %v173_v18 = vpop.f32.mrf.mxu0 }
  0xfd   :  { %191 = vst [vmem:[#allocation8] sm:$0xff] %v173_v18 }
  0xfe   :  { %v175_v19 = vpop.f32.mrf.mxu0 }
  0xff   :  { %180 = vmax.xlane.f32.xlu0 %v175_v19 }
 0x100   :  { %v177_v20 = vpop.f32.mrf.mxu0 }
 0x102   :  { %v178_v21 = vpop.f32.mrf.mxu0 }
 0x188   :  { %v181_v22 = vpop.xlane.xlu0 %180 }
 0x189   :  { %v182_v23 = vsub.f32 %v175_v19, %v181_v22 }
 0x18b   :  { %v183_v24 = vmul.f32 1.442695, %v182_v23 }
 0x18d   :  { %269 = vpow2.f32 %v183_v24 }
 0x19a   :  { %v270_v25 = vpop.eup %269 }
 0x19b   :  { %185 = vadd.xlane.f32.xlu0 %v270_v25 }
 0x19c   :  { %324 = shalt.err (!%p321_p0)
}
 0x19d   :  { %211 = dma.vmem_to_hbm [thread:$0]  %s209_s1, 128, %s403_s3, [#allocation9]  }
 0x19e   :  { %s367_s27 = smov [#allocation7]  }
 0x19f   :  { %s198_s28 = sshll.u32 %s367_s27, 4  ;;  %s199_s28 = int_to_ptr.vmem [resolvable:$true] %s198_s28 }
 0x1a0   :  { %s333_s29 = scalar_lea.vmem %s199_s28, 128  ;;  %p338_p2 = scmp.lt.s32.totalorder %s199_s28, %s199_s28 }
 0x1a1   :  { %p334_p1 = scmp.ne.s32.totalorder %s199_s28, %s333_s29  ;;  %p339_p3 = scmp.lt.s32.totalorder %s333_s29, %s333_s29 }
 0x1a3   :  { %p340_p4 = por %p339_p3, %p338_p2 }
 0x1a5   :  { %p341_p5 = pnand %p340_p4, %p334_p1 }
 0x224   :  { %v186_v26 = vpop.xlane.xlu0 %185 }
 0x225   :  { %271 = vlog2.f32 %v186_v26 }
 0x232   :  { %v272_v27 = vpop.eup %271 }
 0x233   :  { %v188_v28 = vmul.f32 0.6931472, %v272_v27 }
 0x235   :  { %v189_v29 = vsub.f32 %v182_v23, %v188_v28 }
 0x237   :  { %190 = vst [vmem:[#allocation7] sm:$0xff] %v189_v29 }
 0x238   :  { %344 = shalt.err (!%p341_p5)
}
 0x239   :  { %201 = dma.vmem_to_hbm [thread:$0]  %s199_s28, 128, %s402_s2, [#allocation4]  }
 0x23a   :  { %357 = dma.done.wait [#allocation4], 128  }
 0x23b   :  { %358 = vsyncadd [#allocation4], 4294967168 }
 0x23c   :  { %359 = dma.done.wait [#allocation9], 128  }
 0x23d   :  { %360 = vsyncadd [#allocation9], 4294967168 }
 0x23e   :  { %218 = vsyncpa [#allocation3], 1 }
 0x23f   :  { %219 = vsyncpa [#allocation6], 1 }
 0x240   :  { %220 = vsyncpa [#allocation4], 1 }
 0x241   :  { %221 = vsyncpa [#allocation9], 1 }

</bundles_post_ra>
